<compile_context>
chip_gen: v5e
topology: v5e:2x2
jax: 0.10.0
libtpu: 0.0.40
codegen_flags: <defaults>
</compile_context>

<pallas_src>
import functools
import math

import jax
import jax.numpy as jnp
from jax.experimental import pallas as pl
from jax.experimental.pallas import tpu as pltpu


def _cosine_triplet_kernel(a_ref, p_ref, n_ref, o_ref, *, margin, eps,
                           n_total, tile_n, ragged):
    # a/p/n: (TB, TN, D) tiles in VMEM; o: (TB, 1) resident accumulator.
    j = pl.program_id(1)

    @pl.when(j == 0)
    def _init():
        o_ref[...] = jnp.zeros_like(o_ref)

    a = a_ref[...].astype(jnp.float32)
    p = p_ref[...].astype(jnp.float32)
    n = n_ref[...].astype(jnp.float32)

    eps2 = jnp.float32(eps * eps)
    w_a = jnp.sum(a * a, axis=-1)                 # hoisted anchor norm (TB, TN)

    def cos_with_anchor(y):
        dot = jnp.sum(a * y, axis=-1)             # (TB, TN)
        w_y = jnp.sum(y * y, axis=-1)             # (TB, TN)
        # rsqrt * dot  ==  dot / sqrt(clamp_min(w_a*w_y, eps^2))
        return dot * jax.lax.rsqrt(jnp.maximum(w_a * w_y, eps2))

    pos_sim = cos_with_anchor(p)
    neg_sim = cos_with_anchor(n)
    loss = jnp.maximum(neg_sim - pos_sim + jnp.float32(margin), 0.0)  # (TB, TN)

    if ragged:
        # Mask out-of-bounds rows of the final (partial) N tile.
        row = jax.lax.broadcasted_iota(jnp.int32, loss.shape, 1) + j * tile_n
        loss = jnp.where(row < n_total, loss, 0.0)

    o_ref[...] += jnp.sum(loss, axis=-1, keepdims=True)

    @pl.when(j == pl.num_programs(1) - 1)
    def _finalize():
        o_ref[...] = o_ref[...] * jnp.float32(1.0 / n_total)


def cosine_triplet_loss(anchor, positive, negative, margin=0.1, eps=1e-6,
                        tile_b=None, tile_n=None):
    """anchor/positive/negative: (B, N, D) arrays. Returns (B,) float32."""
    B, N, D = anchor.shape
    itemsize = jnp.dtype(anchor.dtype).itemsize

    # ---- batch tile: must divide B exactly and satisfy the (8,.) rule ----
    if tile_b is None:
        TB = 8 if (B % 8 == 0) else B
    else:
        TB = tile_b
    assert B % TB == 0 and (TB % 8 == 0 or TB == B), "bad tile_b"

    # ---- sequence (reduction) tile: ~4 MiB per input tile, multiple of 8 ----
    if tile_n is None:
        target_bytes = 4 * 1024 * 1024
        tn = max(8, (target_bytes // max(1, TB * D * itemsize)) // 8 * 8)
    else:
        tn = tile_n
    if tn >= N:
        TN = N                     # full extent: always a legal block shape
    else:
        TN = int(tn)               # multiple of 8; ragged tail masked in-kernel
    assert TN == N or TN % 8 == 0, "bad tile_n"

    nb = B // TB
    nn = pl.cdiv(N, TN)
    ragged = (N % TN) != 0

    kernel = functools.partial(
        _cosine_triplet_kernel, margin=float(margin), eps=float(eps),
        n_total=N, tile_n=TN, ragged=ragged)

    in_spec = pl.BlockSpec((TB, TN, D), lambda i, j: (i, j, 0))
    out_spec = pl.BlockSpec((TB, 1), lambda i, j: (i, 0))

    cost = pl.CostEstimate(
        flops=10 * B * N * D,             # 5 muls + 5 adds per element (approx)
        transcendentals=2 * B * N,        # two rsqrts per (b, n) pair
        bytes_accessed=3 * B * N * D * itemsize + B * 4,
    )

    out = pl.pallas_call(
        kernel,
        out_shape=jax.ShapeDtypeStruct((B, 1), jnp.float32),
        grid=(nb, nn),                    # reduction axis last
        in_specs=[in_spec, in_spec, in_spec],
        out_specs=out_spec,
        compiler_params=pltpu.CompilerParams(
            dimension_semantics=("parallel", "arbitrary"),
            vmem_limit_bytes=48 * 1024 * 1024,
        ),
        cost_estimate=cost,
    )(anchor, positive, negative)
    return out[:, 0]


def _reference(anchor, positive, negative, margin=0.1, eps=1e-6):
    def cos(x, y):
        dot = jnp.sum(x * y, axis=-1)
        denom = jnp.sqrt(
            jnp.maximum(jnp.sum(x * x, -1) * jnp.sum(y * y, -1), eps * eps))
        return dot / denom

    loss = jax.nn.relu(cos(anchor, negative) - cos(anchor, positive) + margin)
    return jnp.mean(loss, axis=-1)


if __name__ == "__main__":
    key = jax.random.PRNGKey(0)

    # Small shapes implied by the module: batch=2, seq=8, hidden=32.
    B, N, D = 2, 8, 32
    ka, kp, kn = jax.random.split(key, 3)
    anchor = jax.random.normal(ka, (B, N, D), dtype=jnp.float32)
    positive = jax.random.normal(kp, (B, N, D), dtype=jnp.float32)
    negative = jax.random.normal(kn, (B, N, D), dtype=jnp.float32)

    out = jax.block_until_ready(
        cosine_triplet_loss(anchor, positive, negative, margin=0.1))
    ref = _reference(anchor, positive, negative, margin=0.1)
    assert out.shape == (B,)
    assert jnp.allclose(out, ref, atol=1e-5, rtol=1e-5), (out, ref)

    # Second config: forces the tiled/accumulating path with a ragged N tail
    # (N=28 with TN=8 -> 4 N-tiles, last one masked).
    B2, N2, D2 = 2, 28, 32
    k0, k1, k2, k3 = jax.random.split(key, 4)
    a2 = jax.random.normal(k1, (B2, N2, D2), dtype=jnp.float32)
    p2 = jax.random.normal(k2, (B2, N2, D2), dtype=jnp.float32)
    n2 = jax.random.normal(k3, (B2, N2, D2), dtype=jnp.float32)
    out2 = jax.block_until_ready(
        cosine_triplet_loss(a2, p2, n2, margin=0.1, tile_n=8))
    ref2 = _reference(a2, p2, n2, margin=0.1)
    assert jnp.allclose(out2, ref2, atol=1e-5, rtol=1e-5), (out2, ref2)

    print("KERNEL_OK")
</pallas_src>

<mosaic_0001>
module attributes {stable_mosaic.version = 11 : i64} {
  func.func @_cosine_triplet_kernel(%arg0: i32, %arg1: i32, %arg2: memref<2x8x32xf32, #tpu.memory_space<vmem>>, %arg3: memref<2x8x32xf32, #tpu.memory_space<vmem>>, %arg4: memref<2x8x32xf32, #tpu.memory_space<vmem>>, %arg5: memref<2x1xf32, #tpu.memory_space<vmem>>) attributes {dimension_semantics = [#tpu.dimension_semantics<parallel>, #tpu.dimension_semantics<arbitrary>], iteration_bounds = array<i64: 1, 1>, scalar_prefetch = 0 : i64, scratch_operands = 0 : i64, tpu.core_type = #tpu.core_type<tc>, window_params = [{transform_indices = @transform_0, window_bounds = array<i64: 2, 8, 32>}, {transform_indices = @transform_1, window_bounds = array<i64: 2, 8, 32>}, {transform_indices = @transform_2, window_bounds = array<i64: 2, 8, 32>}, {transform_indices = @transform_3, window_bounds = array<i64: 2, 1>}]} {
    %c0_i32 = arith.constant 0 : i32
    %0 = arith.cmpi eq, %arg1, %c0_i32 : i32
    %1 = arith.extui %0 : i1 to i32
    %c0_i32_0 = arith.constant 0 : i32
    %2 = arith.cmpi ne, %1, %c0_i32_0 : i32
    scf.if %2 {
      %cst_24 = arith.constant 0.000000e+00 : f32
      %39 = vector.broadcast %cst_24 : f32 to vector<2x1xf32>
      %c0_25 = arith.constant 0 : index
      %c0_26 = arith.constant 0 : index
      %40 = vector.load %arg5[%c0_25, %c0_26] : memref<2x1xf32, #tpu.memory_space<vmem>>, vector<2x1xf32>
      tpu.vector_store %arg5[%c0_25, %c0_26], %39 {strides = array<i32>} : memref<2x1xf32, #tpu.memory_space<vmem>>, vector<2x1xf32>,
    } else {
    }
    %c0 = arith.constant 0 : index
    %c0_1 = arith.constant 0 : index
    %c0_2 = arith.constant 0 : index
    %3 = vector.load %arg2[%c0, %c0_1, %c0_2] : memref<2x8x32xf32, #tpu.memory_space<vmem>>, vector<2x8x32xf32>
    %c0_3 = arith.constant 0 : index
    %c0_4 = arith.constant 0 : index
    %c0_5 = arith.constant 0 : index
    %4 = vector.load %arg3[%c0_3, %c0_4, %c0_5] : memref<2x8x32xf32, #tpu.memory_space<vmem>>, vector<2x8x32xf32>
    %c0_6 = arith.constant 0 : index
    %c0_7 = arith.constant 0 : index
    %c0_8 = arith.constant 0 : index
    %5 = vector.load %arg4[%c0_6, %c0_7, %c0_8] : memref<2x8x32xf32, #tpu.memory_space<vmem>>, vector<2x8x32xf32>
    %6 = arith.mulf %3, %3 : vector<2x8x32xf32>
    %cst = arith.constant dense<0.000000e+00> : vector<2x8xf32>
    %7 = vector.multi_reduction <add>, %6, %cst [2] : vector<2x8x32xf32> to vector<2x8xf32>
    %8 = arith.mulf %3, %4 : vector<2x8x32xf32>
    %cst_9 = arith.constant dense<0.000000e+00> : vector<2x8xf32>
    %9 = vector.multi_reduction <add>, %8, %cst_9 [2] : vector<2x8x32xf32> to vector<2x8xf32>
    %10 = arith.mulf %4, %4 : vector<2x8x32xf32>
    %cst_10 = arith.constant dense<0.000000e+00> : vector<2x8xf32>
    %11 = vector.multi_reduction <add>, %10, %cst_10 [2] : vector<2x8x32xf32> to vector<2x8xf32>
    %12 = arith.mulf %7, %11 : vector<2x8xf32>
    %cst_11 = arith.constant 9.99999996E-13 : f32
    %13 = vector.broadcast %cst_11 : f32 to vector<2x8xf32>
    %14 = arith.maximumf %12, %13 : vector<2x8xf32>
    %15 = math.rsqrt %14 : vector<2x8xf32>
    %16 = arith.mulf %9, %15 : vector<2x8xf32>
    %17 = arith.mulf %3, %5 : vector<2x8x32xf32>
    %cst_12 = arith.constant dense<0.000000e+00> : vector<2x8xf32>
    %18 = vector.multi_reduction <add>, %17, %cst_12 [2] : vector<2x8x32xf32> to vector<2x8xf32>
    %19 = arith.mulf %5, %5 : vector<2x8x32xf32>
    %cst_13 = arith.constant dense<0.000000e+00> : vector<2x8xf32>
    %20 = vector.multi_reduction <add>, %19, %cst_13 [2] : vector<2x8x32xf32> to vector<2x8xf32>
    %21 = arith.mulf %7, %20 : vector<2x8xf32>
    %cst_14 = arith.constant 9.99999996E-13 : f32
    %22 = vector.broadcast %cst_14 : f32 to vector<2x8xf32>
    %23 = arith.maximumf %21, %22 : vector<2x8xf32>
    %24 = math.rsqrt %23 : vector<2x8xf32>
    %25 = arith.mulf %18, %24 : vector<2x8xf32>
    %26 = arith.subf %25, %16 : vector<2x8xf32>
    %cst_15 = arith.constant 1.000000e-01 : f32
    %27 = vector.broadcast %cst_15 : f32 to vector<2x8xf32>
    %28 = arith.addf %26, %27 : vector<2x8xf32>
    %cst_16 = arith.constant 0.000000e+00 : f32
    %29 = vector.broadcast %cst_16 : f32 to vector<2x8xf32>
    %30 = arith.maximumf %28, %29 : vector<2x8xf32>
    %c0_17 = arith.constant 0 : index
    %c0_18 = arith.constant 0 : index
    %31 = vector.load %arg5[%c0_17, %c0_18] : memref<2x1xf32, #tpu.memory_space<vmem>>, vector<2x1xf32>
    %cst_19 = arith.constant dense<0.000000e+00> : vector<2xf32>
    %32 = vector.multi_reduction <add>, %30, %cst_19 [1] : vector<2x8xf32> to vector<2xf32>
    %33 = vector.shape_cast %32 : vector<2xf32> to vector<2x1xf32>
    %34 = arith.addf %31, %33 : vector<2x1xf32>
    %c0_20 = arith.constant 0 : index
    %c0_21 = arith.constant 0 : index
    %35 = vector.load %arg5[%c0_20, %c0_21] : memref<2x1xf32, #tpu.memory_space<vmem>>, vector<2x1xf32>
    tpu.vector_store %arg5[%c0_20, %c0_21], %34 {strides = array<i32>} : memref<2x1xf32, #tpu.memory_space<vmem>>, vector<2x1xf32>,
    %c0_i32_22 = arith.constant 0 : i32
    %36 = arith.cmpi eq, %arg1, %c0_i32_22 : i32
    %37 = arith.extui %36 : i1 to i32
    %c0_i32_23 = arith.constant 0 : i32
    %38 = arith.cmpi ne, %37, %c0_i32_23 : i32
    scf.if %38 {
      %c0_24 = arith.constant 0 : index
      %c0_25 = arith.constant 0 : index
      %39 = vector.load %arg5[%c0_24, %c0_25] : memref<2x1xf32, #tpu.memory_space<vmem>>, vector<2x1xf32>
      %cst_26 = arith.constant 1.250000e-01 : f32
      %40 = vector.broadcast %cst_26 : f32 to vector<2x1xf32>
      %41 = arith.mulf %39, %40 : vector<2x1xf32>
      %c0_27 = arith.constant 0 : index
      %c0_28 = arith.constant 0 : index
      %42 = vector.load %arg5[%c0_27, %c0_28] : memref<2x1xf32, #tpu.memory_space<vmem>>, vector<2x1xf32>
      tpu.vector_store %arg5[%c0_27, %c0_28], %41 {strides = array<i32>} : memref<2x1xf32, #tpu.memory_space<vmem>>, vector<2x1xf32>,
    } else {
    }
    return
  }
  func.func @transform_0(%arg0: i32, %arg1: i32) -> (i32, i32, i32) {
    %c0_i32 = arith.constant 0 : i32
    %c0_i32_0 = arith.constant 0 : i32
    return %arg0, %arg1, %c0_i32 : i32, i32, i32
  }
  func.func @transform_1(%arg0: i32, %arg1: i32) -> (i32, i32, i32) {
    %c0_i32 = arith.constant 0 : i32
    %c0_i32_0 = arith.constant 0 : i32
    return %arg0, %arg1, %c0_i32 : i32, i32, i32
  }
  func.func @transform_2(%arg0: i32, %arg1: i32) -> (i32, i32, i32) {
    %c0_i32 = arith.constant 0 : i32
    %c0_i32_0 = arith.constant 0 : i32
    return %arg0, %arg1, %c0_i32 : i32, i32, i32
  }
  func.func @transform_3(%arg0: i32, %arg1: i32) -> (i32, i32) {
    %c0_i32 = arith.constant 0 : i32
    %c0_i32_0 = arith.constant 0 : i32
    return %arg0, %c0_i32 : i32, i32
  }
}

</mosaic_0001>

<bundles_post_ra>
// kernel: tpu_custom_call.1
= control target key start
LH: loop header
LB: loop body
LE: loop exit
PB: predicated region body
PF: predicated region fallthrough
CT: control target
= control target key end

     0   :  { %8 = vsyncpa [#allocation3], 0  ;;  %s354_s0 = inlined_call_operand.hbm [shape: f32[2,8,32], index: 0, kind: input, shape index: {}]   ;;  %s355_s1 = inlined_call_operand.hbm [shape: f32[2,8,32], index: 1, kind: input, shape index: {}]   ;;  %s356_s2 = inlined_call_operand.hbm [shape: f32[2,8,32], index: 2, kind: input, shape index: {}]   ;;  %s357_s3 = inlined_call_operand.vmem [shape: f32[2,1], index: 3, kind: output, shape index: {}]  }
   0x1   :  { %9 = vsyncpa [#allocation5], 0  ;;  %s27_s14 = sshll.u32 %s355_s1, 4  ;;  %s291_s15 = smov [#allocation4]   ;;  %s28_s14 = int_to_ptr.hbm [resolvable:$true] %s27_s14 }
   0x2   :  { %s29_s16 = sshll.u32 %s291_s15, 4  ;;  %s14_s19 = sshll.u32 %s354_s0, 4  ;;  %s30_s16 = int_to_ptr.vmem [resolvable:$true] %s29_s16  ;;  %s15_s19 = int_to_ptr.hbm [resolvable:$true] %s14_s19 }
   0x3   :  { %s292_s20 = smov 128   ;;  %s293_s21 = smov 8  }
   0x4   :  { %35 = dma.hbm_to_vmem [thread:$0]  %s28_s14, 256, %s30_s16, [#allocation5], %s292_s20, %s292_s20, %s293_s21  }
   0x5   :  { %s294_s22 = smov [#allocation2]   ;;  %s40_s26 = sshll.u32 %s356_s2, 4  ;;  %s41_s26 = int_to_ptr.hbm [resolvable:$true] %s40_s26 }
   0x6   :  { %s16_s23 = sshll.u32 %s294_s22, 4  ;;  %s295_s1 = smov [#allocation6]   ;;  %s17_s23 = int_to_ptr.vmem [resolvable:$true] %s16_s23 }
   0x7   :  { %22 = dma.hbm_to_vmem [thread:$0]  %s15_s19, 256, %s17_s23, [#allocation3], %s292_s20, %s292_s20, %s293_s21  }
   0x8   :  { %s42_s27 = sshll.u32 %s295_s1, 4  ;;  %s43_s27 = int_to_ptr.vmem [resolvable:$true] %s42_s27 }
   0x9   :  { %48 = dma.hbm_to_vmem [thread:$0]  %s41_s26, 256, %s43_s27, [#allocation5], %s292_s20, %s292_s20, %s293_s21  }
   0xa   :  { %287 = dma.done.wait [#allocation3], 256  }
   0xb   :  { %288 = vsyncadd [#allocation3], 4294967040 }
   0xc   :  { %289 = dma.done.wait [#allocation5], 512  }
   0xd   :  { %290 = vsyncadd [#allocation5], 4294966784  ;;  %v71_v0 = vld [vmem:[#allocation6] sm:$0xff]  ;;  %vm75_vm0 = vcmask 261120   ;;  %v69_v1 = vld [vmem:[#allocation4] sm:$0xff]  ;;  %vm65_vm1 = vcmask 1024  }
   0xe   :  { %v67_v2 = vld [vmem:[#allocation2] sm:$0xff]  ;;  %v132_v3 = vmul.f32 %v71_v0, %v71_v0  ;;  %v90_v4 = vmul.f32 %v69_v1, %v69_v1  ;;  %v72_v6 = vld [vmem:[#allocation6 + $0x8] sm:$0xff]  ;;  %v70_v7 = vld [vmem:[#allocation4 + $0x8] sm:$0xff]  ;;  %v296_v44 = vmov 0.0   ;;  %vm179_vm14 = vcmask 1041409  }
   0xf   :  { %v73_v5 = vmul.f32 %v67_v2, %v67_v2  ;;  %v68_v11 = vld [vmem:[#allocation2 + $0x8] sm:$0xff]  ;;  %v133_v12 = vmul.f32 %v72_v6, %v72_v6  ;;  %v91_v13 = vmul.f32 %v70_v7, %v70_v7  ;;  %v124_v18 = vmul.f32 %v71_v0, %v67_v2  ;;  %66 = vst.msk [vmem:[%s357_s3] sm:$0x3] %vm65_vm1, %v296_v44 }
  0x10   :  { %v134_v8 = vsel %vm75_vm0, %v132_v3, 0.0  ;;  %v92_v9 = vsel %vm75_vm0, %v90_v4, 0.0  ;;  %v74_v14 = vmul.f32 %v68_v11, %v68_v11  ;;  %v83_v19 = vmul.f32 %v70_v7, %v68_v11 }
  0x11   :  { %v76_v10 = vsel %vm75_vm0, %v73_v5, 0.0  ;;  %135 = vadd.xlane.f32.xlu2 %v134_v8  ;;  %93 = vadd.xlane.f32.xlu1 %v92_v9  ;;  %v137_v15 = vsel %vm75_vm0, %v133_v12, 0.0  ;;  %v95_v16 = vsel %vm75_vm0, %v91_v13, 0.0  ;;  %v82_v20 = vmul.f32 %v69_v1, %v67_v2 }
  0x12   :  { %77 = vadd.xlane.f32.xlu0 %v76_v10  ;;  %v79_v17 = vsel %vm75_vm0, %v74_v14, 0.0  ;;  %v126_v21 = vsel %vm75_vm0, %v124_v18, 0.0  ;;  %v87_v22 = vsel %vm75_vm0, %v83_v19, 0.0  ;;  %v125_v24 = vmul.f32 %v72_v6, %v68_v11 }
  0x13   :  { %v84_v23 = vsel %vm75_vm0, %v82_v20, 0.0  ;;  %v175_v13 = vlaneseq  ;;  %vm182_vm15 = vcmask 58368  }
  0x14   :  { %v129_v25 = vsel %vm75_vm0, %v125_v24, 0.0 }
  0x19   :  { %138 = vadd.xlane.f32.xlu2 %v137_v15  ;;  %96 = vadd.xlane.f32.xlu1 %v95_v16 }
  0x1a   :  { %80 = vadd.xlane.f32.xlu0 %v79_v17  ;;  %v176_v17 = vand.u32 127, %v175_v13 }
  0x21   :  { %127 = vadd.xlane.f32.xlu2 %v126_v21  ;;  %88 = vadd.xlane.f32.xlu1 %v87_v22 }
  0x22   :  { %85 = vadd.xlane.f32.xlu0 %v84_v23 }
  0x2a   :  { %130 = vadd.xlane.f32.xlu0 %v129_v25  ;;  %v172_v25 = vld [vmem:[%s357_s3] sm:$0x3] }
  0x84   :  { %v136_v26 = vpop.xlane.xlu2 %135  ;;  %v94_v27 = vpop.xlane.xlu1 %93 }
  0x85   :  { %v78_v28 = vpop.xlane.xlu0 %77 }
  0x86   :  { %v98_v29 = vmul.f32 %v94_v27, %v78_v28  ;;  %v140_v30 = vmul.f32 %v136_v26, %v78_v28 }
  0x88   :  { %v100_v31 = vmax.f32 %v98_v29, 1e-12  ;;  %v142_v32 = vmax.f32 %v140_v30, 1e-12 }
  0x8a   :  { %207 = vrsqrt.f32 %v100_v31  ;;  %vm108_vm4 = vweird.f32 %v100_v31  ;;  %vm150_vm5 = vweird.f32 %v142_v32 }
  0x8b   :  { %209 = vrsqrt.f32 %v142_v32 }
  0x8c   :  { %v139_v33 = vpop.xlane.xlu2 %138  ;;  %v97_v34 = vpop.xlane.xlu1 %96 }
  0x8d   :  { %v81_v35 = vpop.xlane.xlu0 %80 }
  0x8e   :  { %v99_v36 = vmul.f32 %v97_v34, %v81_v35  ;;  %v141_v37 = vmul.f32 %v139_v33, %v81_v35 }
  0x90   :  { %v208_v38 = vpop.eup %207  ;;  %v101_v39 = vmax.f32 %v99_v36, 1e-12  ;;  %v143_v40 = vmax.f32 %v141_v37, 1e-12 }
  0x91   :  { %v210_v41 = vpop.eup %209  ;;  %v103_v42 = vmul.f32 %v208_v38, %v100_v31  ;;  %vm109_vm2 = vweird.f32 %v208_v38 }
  0x92   :  { %v145_v43 = vmul.f32 %v210_v41, %v142_v32  ;;  %211 = vrsqrt.f32 %v101_v39  ;;  %vm151_vm3 = vweird.f32 %v210_v41  ;;  %vm110_vm6 = vmor %vm108_vm4, %vm109_vm2  ;;  %vm118_vm10 = vweird.f32 %v101_v39 }
  0x93   :  { %v104_v45 = vmul.f32 %v208_v38, %v103_v42  ;;  %213 = vrsqrt.f32 %v143_v40  ;;  %vm152_vm7 = vmor %vm150_vm5, %vm151_vm3  ;;  %vm160_vm12 = vweird.f32 %v143_v40 }
  0x94   :  { %v146_v46 = vmul.f32 %v210_v41, %v145_v43  ;;  %v128_v57 = vpop.xlane.xlu2 %127  ;;  %v89_v6 = vpop.xlane.xlu1 %88 }
  0x95   :  { %v105_v47 = vmul.f32 0.5, %v104_v45  ;;  %v86_v52 = vpop.xlane.xlu0 %85 }
  0x96   :  { %v147_v48 = vmul.f32 0.5, %v146_v46 }
  0x97   :  { %v106_v49 = vsub.f32 1.5, %v105_v47 }
  0x98   :  { %v212_v50 = vpop.eup %211  ;;  %v148_v51 = vsub.f32 1.5, %v147_v48 }
  0x99   :  { %v214_v53 = vpop.eup %213  ;;  %v113_v54 = vmul.f32 %v212_v50, %v101_v39  ;;  %v107_v55 = vmul.f32 %v208_v38, %v106_v49  ;;  %vm119_vm8 = vweird.f32 %v212_v50 }
  0x9a   :  { %v155_v56 = vmul.f32 %v214_v53, %v143_v40  ;;  %v149_v58 = vmul.f32 %v210_v41, %v148_v51  ;;  %vm161_vm9 = vweird.f32 %v214_v53  ;;  %vm120_vm11 = vmor %vm118_vm10, %vm119_vm8 }
  0x9b   :  { %v114_v59 = vmul.f32 %v212_v50, %v113_v54  ;;  %v111_v60 = vsel %vm110_vm6, %v208_v38, %v107_v55  ;;  %vm162_vm13 = vmor %vm160_vm12, %vm161_vm9 }
  0x9c   :  { %v156_v61 = vmul.f32 %v214_v53, %v155_v56  ;;  %v153_v62 = vsel %vm152_vm7, %v210_v41, %v149_v58  ;;  %v122_v0 = vmul.f32 %v111_v60, %v86_v52 }
  0x9d   :  { %v164_v63 = vmul.f32 %v153_v62, %v128_v57  ;;  %v115_v1 = vmul.f32 0.5, %v114_v59  ;;  %v131_v9 = vpop.xlane.xlu0 %130 }
  0x9e   :  { %v157_v2 = vmul.f32 0.5, %v156_v61 }
  0x9f   :  { %v116_v3 = vsub.f32 1.5, %v115_v1  ;;  %v166_v5 = vsub.f32 %v164_v63, %v122_v0 }
  0xa0   :  { %v158_v4 = vsub.f32 1.5, %v157_v2 }
  0xa1   :  { %v117_v7 = vmul.f32 %v212_v50, %v116_v3  ;;  %v168_v14 = vadd.f32 0.1, %v166_v5 }
  0xa2   :  { %v159_v8 = vmul.f32 %v214_v53, %v158_v4 }
  0xa3   :  { %v121_v10 = vsel %vm120_vm11, %v212_v50, %v117_v7  ;;  %v170_v18 = vmax.f32 %v168_v14, 0.0 }
  0xa4   :  { %v123_v11 = vmul.f32 %v121_v10, %v89_v6  ;;  %v163_v12 = vsel %vm162_vm13, %v214_v53, %v159_v8 }
  0xa5   :  { %v165_v15 = vmul.f32 %v163_v12, %v131_v9  ;;  %v177_v21 = vperm.slane %v170_v18, %v176_v17 }
  0xa7   :  { %v167_v16 = vsub.f32 %v165_v15, %v123_v11 }
  0xa9   :  { %v169_v19 = vadd.f32 0.1, %v167_v16 }
  0xab   :  { %v171_v20 = vmax.f32 %v169_v19, 0.0 }
  0xad   :  { %v178_v22 = vperm.slane %v171_v20, %v176_v17 }
  0xaf   :  { %v180_v23 = vsel %vm179_vm14, %v178_v22, %v177_v21 }
  0xb0   :  { %v183_v24 = vsel %vm182_vm15, %v180_v23, 0.0 }
  0xb1   :  { %184 = vadd.xlane.f32.xlu1 %v183_v24 }
 0x124   :  { %v185_v26 = vpop.xlane.xlu1 %184 }
 0x125   :  { %v186_v27 = vadd.f32 %v185_v26, %v172_v25 }
 0x127   :  { %188 = vst.msk [vmem:[%s357_s3] sm:$0x3] %vm65_vm1, %v186_v27 }
 0x12e   :  { %v192_v28 = vld [vmem:[%s357_s3] sm:$0x3] }
 0x12f   :  { %v193_v29 = vmul.f32 0.125, %v192_v28 }
 0x131   :  { %194 = vst.msk [vmem:[%s357_s3] sm:$0x3] %vm65_vm1, %v193_v29 }
 0x132   :  { %199 = vsyncpa [#allocation3], 1 }
 0x133   :  { %200 = vsyncpa [#allocation5], 1 }

</bundles_post_ra>
